<compile_context>
chip_gen: v5e
topology: v5e:2x2
jax: 0.10.0
libtpu: 0.0.40
codegen_flags: <defaults>
</compile_context>

<pallas_src>
import jax
import jax.numpy as jnp
from jax.experimental import pallas as pl
from jax.experimental.pallas import tpu as pltpu

HIDDEN = 64
LANE = 128  # TPU lane width; batch tiles are multiples of this


def _mlp_kernel(xt_ref, w1_ref, b1_ref, w2_ref, b2_ref, w3_ref, b3_ref, o_ref):
    """Fused MLP, batch on the lane axis.

    Per grid step (TB = batch tile):
      xt_ref : (in_dim, TB)     w1: (64, in_dim)   b1: (64, 1)
      h1     : (64, TB)         w2: (64, 64)       b2: (64, 1)
      h2     : (64, TB)         w3: (out_dim, 64)  b3: (out_dim, 1)
      o_ref  : (out_dim, TB)   <- lane-dense output store
    """
    h1 = jnp.dot(w1_ref[...], xt_ref[...], preferred_element_type=jnp.float32)
    h1 = jnp.maximum(h1 + b1_ref[...], 0.0)
    h2 = jnp.dot(w2_ref[...], h1, preferred_element_type=jnp.float32)
    h2 = jnp.maximum(h2 + b2_ref[...], 0.0)
    out = jnp.dot(w3_ref[...], h2, preferred_element_type=jnp.float32) + b3_ref[...]
    o_ref[...] = out.astype(o_ref.dtype)


def state_action_value_net(x, params, *, tb_max=2048):
    """Fused forward pass. x: (B, input_dim) float32 -> (B, output_dim) float32.

    tb_max: max batch-tile width (lanes). 2048 keeps double-buffered x/out plus the
    f32 h1/h2 temporaries well under the scoped VMEM limit on v5e/v6e and v7x.
    """
    w1, b1, w2, b2, w3, b3 = params          # torch layout: w (out, in), b (out, 1)
    B, in_dim = x.shape
    out_dim = w3.shape[0]

    # Batch lives on the lane axis -> tile must be a multiple of 128; pad B up to the grid.
    tb = min(tb_max, pl.cdiv(B, LANE) * LANE)
    n_tiles = pl.cdiv(B, tb)
    Bp = n_tiles * tb

    # Wrapper-side layout plumbing: transpose to batch-on-lanes and zero-pad the tail tile.
    xt = jnp.zeros((in_dim, Bp), x.dtype).at[:, :B].set(x.T)

    flops = 2 * Bp * (in_dim * HIDDEN + HIDDEN * HIDDEN + HIDDEN * out_dim)
    bytes_accessed = 4 * (Bp * in_dim + Bp * out_dim
                          + w1.size + b1.size + w2.size + b2.size + w3.size + b3.size)

    # Weights/biases: full-array blocks, constant index_map -> stay VMEM-resident.
    resident = lambda a: pl.BlockSpec(a.shape, lambda i: (0,) * a.ndim)

    out_t = pl.pallas_call(
        _mlp_kernel,
        out_shape=jax.ShapeDtypeStruct((out_dim, Bp), x.dtype),
        grid=(n_tiles,),
        in_specs=[
            pl.BlockSpec((in_dim, tb), lambda i: (0, i)),   # streamed, double-buffered
            resident(w1), resident(b1),
            resident(w2), resident(b2),
            resident(w3), resident(b3),
        ],
        out_specs=pl.BlockSpec((out_dim, tb), lambda i: (0, i)),  # lane-dense stores
        compiler_params=pltpu.CompilerParams(
            dimension_semantics=("parallel",),   # batch tiles independent -> megacore on v7x
        ),
        cost_estimate=pl.CostEstimate(
            flops=flops, transcendentals=0, bytes_accessed=bytes_accessed),
    )(xt, w1, b1, w2, b2, w3, b3)

    # Back to the module's (B, out_dim) layout; drop batch padding.
    return out_t[:, :B].T


def init_params(key, action_dim, state_dim, output_dim=1, hidden=HIDDEN):
    """Deterministic synthetic init, torch-Linear layout: W (out, in), b (out, 1)."""
    input_dim = action_dim + state_dim
    ks = jax.random.split(key, 6)

    def lin(kw, kb, fan_in, fan_out):
        # torch Linear default init: U(-1/sqrt(fan_in), 1/sqrt(fan_in))
        bound = 1.0 / jnp.sqrt(jnp.float32(fan_in))
        w = jax.random.uniform(kw, (fan_out, fan_in), jnp.float32, -bound, bound)
        b = jax.random.uniform(kb, (fan_out, 1), jnp.float32, -bound, bound)
        return w, b

    w1, b1 = lin(ks[0], ks[1], input_dim, hidden)
    w2, b2 = lin(ks[2], ks[3], hidden, hidden)
    w3, b3 = lin(ks[4], ks[5], hidden, output_dim)
    return (w1, b1, w2, b2, w3, b3)


def _ref_forward(x, params):
    w1, b1, w2, b2, w3, b3 = params
    h1 = jnp.maximum(x @ w1.T + b1.T, 0.0)
    h2 = jnp.maximum(h1 @ w2.T + b2.T, 0.0)
    return h2 @ w3.T + b3.T


if __name__ == "__main__":
    key = jax.random.PRNGKey(0)
    action_dim, state_dim, output_dim = 4, 12, 1   # input_dim = 16

    k_x, k_p, k_x2 = jax.random.split(key, 3)
    params = init_params(k_p, action_dim, state_dim, output_dim)

    # Small batch (single tile, padded to 128 lanes).
    batch = 8
    x = jax.random.normal(k_x, (batch, action_dim + state_dim), jnp.float32)
    out = jax.block_until_ready(state_action_value_net(x, params))
    ref = _ref_forward(x, params)
    assert out.shape == (batch, output_dim), out.shape
    assert jnp.allclose(out, ref, atol=1e-5, rtol=1e-5), "mismatch vs JAX reference (B=8)"

    # Non-multiple batch with a multi-tile grid (exercises padding + streamed tiles).
    batch2 = 300
    x2 = jax.random.normal(k_x2, (batch2, action_dim + state_dim), jnp.float32)
    out2 = jax.block_until_ready(state_action_value_net(x2, params, tb_max=128))
    ref2 = _ref_forward(x2, params)
    assert out2.shape == (batch2, output_dim), out2.shape
    assert jnp.allclose(out2, ref2, atol=1e-5, rtol=1e-5), "mismatch vs JAX reference (B=300)"

    print("KERNEL_OK")
</pallas_src>

<mosaic_0001>
module attributes {stable_mosaic.version = 11 : i64} {
  func.func @_mlp_kernel(%arg0: i32, %arg1: memref<16x128xf32, #tpu.memory_space<vmem>>, %arg2: memref<64x16xf32, #tpu.memory_space<vmem>>, %arg3: memref<64x1xf32, #tpu.memory_space<vmem>>, %arg4: memref<64x64xf32, #tpu.memory_space<vmem>>, %arg5: memref<64x1xf32, #tpu.memory_space<vmem>>, %arg6: memref<1x64xf32, #tpu.memory_space<vmem>>, %arg7: memref<1x1xf32, #tpu.memory_space<vmem>>, %arg8: memref<1x128xf32, #tpu.memory_space<vmem>>) attributes {dimension_semantics = [#tpu.dimension_semantics<parallel>], iteration_bounds = array<i64: 1>, scalar_prefetch = 0 : i64, scratch_operands = 0 : i64, tpu.core_type = #tpu.core_type<tc>, window_params = [{transform_indices = @transform_0, window_bounds = array<i64: 16, 128>}, {pipeline_mode = #tpu.pipeline_mode<synchronous>, transform_indices = @transform_1, window_bounds = array<i64: 64, 16>}, {pipeline_mode = #tpu.pipeline_mode<synchronous>, transform_indices = @transform_2, window_bounds = array<i64: 64, 1>}, {pipeline_mode = #tpu.pipeline_mode<synchronous>, transform_indices = @transform_3, window_bounds = array<i64: 64, 64>}, {pipeline_mode = #tpu.pipeline_mode<synchronous>, transform_indices = @transform_4, window_bounds = array<i64: 64, 1>}, {pipeline_mode = #tpu.pipeline_mode<synchronous>, transform_indices = @transform_5, window_bounds = array<i64: 1, 64>}, {pipeline_mode = #tpu.pipeline_mode<synchronous>, transform_indices = @transform_6, window_bounds = array<i64: 1, 1>}, {transform_indices = @transform_7, window_bounds = array<i64: 1, 128>}]} {
    %c0 = arith.constant 0 : index
    %c0_0 = arith.constant 0 : index
    %0 = vector.load %arg2[%c0, %c0_0] : memref<64x16xf32, #tpu.memory_space<vmem>>, vector<64x16xf32>
    %c0_1 = arith.constant 0 : index
    %c0_2 = arith.constant 0 : index
    %1 = vector.load %arg1[%c0_1, %c0_2] : memref<16x128xf32, #tpu.memory_space<vmem>>, vector<16x128xf32>
    %cst = arith.constant dense<0.000000e+00> : vector<64x128xf32>
    %2 = tpu.matmul %0, %1, %cst {dimension_numbers = #tpu.dot_dimension_numbers<[1], [0], [0], [1], [0, 0, 1, 1], [], []>} : vector<64x16xf32>, vector<16x128xf32>, vector<64x128xf32> -> vector<64x128xf32>
    %c0_3 = arith.constant 0 : index
    %c0_4 = arith.constant 0 : index
    %3 = vector.load %arg3[%c0_3, %c0_4] : memref<64x1xf32, #tpu.memory_space<vmem>>, vector<64x1xf32>
    %4 = vector.broadcast %3 : vector<64x1xf32> to vector<64x128xf32>
    %5 = arith.addf %2, %4 : vector<64x128xf32>
    %cst_5 = arith.constant 0.000000e+00 : f32
    %6 = vector.broadcast %cst_5 : f32 to vector<64x128xf32>
    %7 = arith.maximumf %5, %6 : vector<64x128xf32>
    %c0_6 = arith.constant 0 : index
    %c0_7 = arith.constant 0 : index
    %8 = vector.load %arg4[%c0_6, %c0_7] : memref<64x64xf32, #tpu.memory_space<vmem>>, vector<64x64xf32>
    %cst_8 = arith.constant dense<0.000000e+00> : vector<64x128xf32>
    %9 = tpu.matmul %8, %7, %cst_8 {dimension_numbers = #tpu.dot_dimension_numbers<[1], [0], [0], [1], [0, 0, 1, 1], [], []>} : vector<64x64xf32>, vector<64x128xf32>, vector<64x128xf32> -> vector<64x128xf32>
    %c0_9 = arith.constant 0 : index
    %c0_10 = arith.constant 0 : index
    %10 = vector.load %arg5[%c0_9, %c0_10] : memref<64x1xf32, #tpu.memory_space<vmem>>, vector<64x1xf32>
    %11 = vector.broadcast %10 : vector<64x1xf32> to vector<64x128xf32>
    %12 = arith.addf %9, %11 : vector<64x128xf32>
    %cst_11 = arith.constant 0.000000e+00 : f32
    %13 = vector.broadcast %cst_11 : f32 to vector<64x128xf32>
    %14 = arith.maximumf %12, %13 : vector<64x128xf32>
    %c0_12 = arith.constant 0 : index
    %c0_13 = arith.constant 0 : index
    %15 = vector.load %arg6[%c0_12, %c0_13] : memref<1x64xf32, #tpu.memory_space<vmem>>, vector<1x64xf32>
    %cst_14 = arith.constant dense<0.000000e+00> : vector<1x128xf32>
    %16 = tpu.matmul %15, %14, %cst_14 {dimension_numbers = #tpu.dot_dimension_numbers<[1], [0], [0], [1], [0, 0, 1, 1], [], []>} : vector<1x64xf32>, vector<64x128xf32>, vector<1x128xf32> -> vector<1x128xf32>
    %c0_15 = arith.constant 0 : index
    %c0_16 = arith.constant 0 : index
    %17 = vector.load %arg7[%c0_15, %c0_16] : memref<1x1xf32, #tpu.memory_space<vmem>>, vector<1x1xf32>
    %18 = vector.broadcast %17 : vector<1x1xf32> to vector<1x128xf32>
    %19 = arith.addf %16, %18 : vector<1x128xf32>
    %c0_17 = arith.constant 0 : index
    %c0_18 = arith.constant 0 : index
    %20 = vector.load %arg8[%c0_17, %c0_18] : memref<1x128xf32, #tpu.memory_space<vmem>>, vector<1x128xf32>
    tpu.vector_store %arg8[%c0_17, %c0_18], %19 {strides = array<i32>} : memref<1x128xf32, #tpu.memory_space<vmem>>, vector<1x128xf32>,
    return
  }
  func.func @transform_0(%arg0: i32) -> (i32, i32) {
    %c0_i32 = arith.constant 0 : i32
    %c0_i32_0 = arith.constant 0 : i32
    return %c0_i32, %arg0 : i32, i32
  }
  func.func @transform_1(%arg0: i32) -> (i32, i32) {
    %c0_i32 = arith.constant 0 : i32
    %c0_i32_0 = arith.constant 0 : i32
    %c0_i32_1 = arith.constant 0 : i32
    return %c0_i32, %c0_i32_0 : i32, i32
  }
  func.func @transform_2(%arg0: i32) -> (i32, i32) {
    %c0_i32 = arith.constant 0 : i32
    %c0_i32_0 = arith.constant 0 : i32
    %c0_i32_1 = arith.constant 0 : i32
    return %c0_i32, %c0_i32_0 : i32, i32
  }
  func.func @transform_3(%arg0: i32) -> (i32, i32) {
    %c0_i32 = arith.constant 0 : i32
    %c0_i32_0 = arith.constant 0 : i32
    %c0_i32_1 = arith.constant 0 : i32
    return %c0_i32, %c0_i32_0 : i32, i32
  }
  func.func @transform_4(%arg0: i32) -> (i32, i32) {
    %c0_i32 = arith.constant 0 : i32
    %c0_i32_0 = arith.constant 0 : i32
    %c0_i32_1 = arith.constant 0 : i32
    return %c0_i32, %c0_i32_0 : i32, i32
  }
  func.func @transform_5(%arg0: i32) -> (i32, i32) {
    %c0_i32 = arith.constant 0 : i32
    %c0_i32_0 = arith.constant 0 : i32
    %c0_i32_1 = arith.constant 0 : i32
    return %c0_i32, %c0_i32_0 : i32, i32
  }
  func.func @transform_6(%arg0: i32) -> (i32, i32) {
    %c0_i32 = arith.constant 0 : i32
    %c0_i32_0 = arith.constant 0 : i32
    %c0_i32_1 = arith.constant 0 : i32
    return %c0_i32, %c0_i32_0 : i32, i32
  }
  func.func @transform_7(%arg0: i32) -> (i32, i32) {
    %c0_i32 = arith.constant 0 : i32
    %c0_i32_0 = arith.constant 0 : i32
    return %c0_i32, %arg0 : i32, i32
  }
}

</mosaic_0001>

<bundles_post_ra>
// kernel: tpu_custom_call.1
= control target key start
LH: loop header
LB: loop body
LE: loop exit
PB: predicated region body
PF: predicated region fallthrough
CT: control target
= control target key end

     0   :  { %s567_s0 = inlined_call_operand.vmem [shape: f32[16,128], index: 0, kind: input, shape index: {}]   ;;  %s568_s1 = inlined_call_operand.vmem [shape: f32[64,16], index: 1, kind: input, shape index: {}]   ;;  %s569_s2 = inlined_call_operand.vmem [shape: f32[64,1], index: 2, kind: input, shape index: {}]   ;;  %s570_s3 = inlined_call_operand.vmem [shape: f32[64,64], index: 3, kind: input, shape index: {}]   ;;  %s571_s4 = inlined_call_operand.vmem [shape: f32[64,1], index: 4, kind: input, shape index: {}]   ;;  %s572_s5 = inlined_call_operand.vmem [shape: f32[1,64], index: 5, kind: input, shape index: {}]   ;;  %s573_s6 = inlined_call_operand.<no memory space> [shape: f32[1,1], index: 6, kind: input, shape index: {}]   ;;  %s574_s7 = inlined_call_operand.hbm [shape: f32[1,128], index: 7, kind: output, shape index: {}]  }
   0x1   :  { %v12_v0 = vstv %s573_s6 }
   0x2   :  { %13 = vst [vmem:[#allocation2] sm:$0x1] %v12_v0 }
   0x3   :  { %v38_v1 = vld [vmem:[%s567_s0 + $0x8] sm:$0xff]  ;;  %v46_v2 = vld [vmem:[%s569_s2 + $0x38] sm:$0xff]  ;;  %v397_v4 = vmov 0   ;;  %v37_v5 = vld [vmem:[%s567_s0] sm:$0xff]  ;;  %vm87_vm0 = vcmask 130048  }
   0x4   :  { %v44_v3 = vld [vmem:[%s569_s2 + $0x28] sm:$0xff]  ;;  %369 = vset.pattern.permute.xlu1 %v397_v4  ;;  %368 = vset.pattern.permute.xlu0 %v397_v4  ;;  %v29_v6 = vld [vmem:[%s568_s1] sm:$0xff]  ;;  %v42_v8 = vld [vmem:[%s569_s2 + $0x18] sm:$0xff] }
   0x5   :  { %126 = vmatpush.msra.mxu0 %v38_v1  ;;  %356 = vmatpush.msra.mxu2 %v38_v1  ;;  %v34_v7 = vld [vmem:[%s568_s1 + $0x28] sm:$0xff] }
   0x6   :  { %84 = vperm.xlu0 %368, %v46_v2   ;;  %74 = vperm.xlu1 %369, %v44_v3  }
   0x7   :  { %127 = vmatpush.msra.mxu0 %v37_v5  ;;  %357 = vmatpush.msra.mxu2 %v37_v5 }
   0x8   :  { %339 = vmatmul.msk.f32.vlgmr.msra.gmra.mxu0 %vm87_vm0, %v29_v6  ;;  %344 = vmatmul.msk.f32.vlgmr.msra.gmra.mxu2 %vm87_vm0, %v34_v7 }
   0x9   :  { %370 = vset.pattern.permute.xlu2 %v397_v4 }
   0xa   :  { %64 = vperm.xlu2 %370, %v42_v8  }
   0xb   :  { %14 = vsyncpa [#allocation4], 0  ;;  %v45_v9 = vld [vmem:[%s569_s2 + $0x30] sm:$0xff]  ;;  %v43_v10 = vld [vmem:[%s569_s2 + $0x20] sm:$0xff]  ;;  %vm217_vm1 = vcmask 523264   ;;  %s398_s16 = smov [#allocation3]  }
   0xc   :  { %v30_v11 = vld [vmem:[%s568_s1 + $0x8] sm:$0xff]  ;;  %v35_v12 = vld [vmem:[%s568_s1 + $0x30] sm:$0xff]  ;;  %v39_v15 = vld [vmem:[%s569_s2] sm:$0xff]  ;;  %s328_s17 = sshll.u32 %s398_s16, 4  ;;  %s330_s20 = sshll.u32 %s574_s7, 4  ;;  %s329_s17 = int_to_ptr.vmem [resolvable:$true] %s328_s17  ;;  %s331_s20 = int_to_ptr.hbm [resolvable:$true] %s330_s20 }
   0xd   :  { %v41_v13 = vld [vmem:[%s569_s2 + $0x10] sm:$0xff]  ;;  %v40_v14 = vld [vmem:[%s569_s2 + $0x8] sm:$0xff]  ;;  %v36_v17 = vld [vmem:[%s568_s1 + $0x38] sm:$0xff] }
   0xe   :  { %79 = vperm.xlu0 %368, %v45_v9   ;;  %69 = vperm.xlu1 %369, %v43_v10   ;;  %v31_v16 = vld [vmem:[%s568_s1 + $0x10] sm:$0xff]  ;;  %v176_v18 = vld [vmem:[%s571_s4 + $0x38] sm:$0xff]  ;;  %v174_v20 = vld [vmem:[%s571_s4 + $0x28] sm:$0xff] }
   0xf   :  { %v175_v19 = vld [vmem:[%s571_s4 + $0x30] sm:$0xff]  ;;  %v32_v21 = vld [vmem:[%s568_s1 + $0x18] sm:$0xff]  ;;  %v173_v22 = vld [vmem:[%s571_s4 + $0x20] sm:$0xff] }
  0x10   :  { %340 = vmatmul.msk.f32.gmra.mxu0 %vm87_vm0, %v30_v11  ;;  %345 = vmatmul.msk.f32.gmra.mxu2 %vm87_vm0, %v35_v12  ;;  %v172_v23 = vld [vmem:[%s571_s4 + $0x18] sm:$0xff]  ;;  %v171_v24 = vld [vmem:[%s571_s4 + $0x10] sm:$0xff]  ;;  %v33_v25 = vld [vmem:[%s568_s1 + $0x20] sm:$0xff] }
  0x11   :  { %v170_v26 = vld [vmem:[%s571_s4 + $0x8] sm:$0xff]  ;;  %v169_v27 = vld [vmem:[%s571_s4] sm:$0xff]  ;;  %v163_v1 = vld [vmem:[%s570_s3 + $0x10] sm:$0xff] }
  0x12   :  { %59 = vperm.xlu2 %370, %v41_v13   ;;  %v292_v28 = vld [vmem:[#allocation2] sm:$0x1]  ;;  %v162_v63 = vld [vmem:[%s570_s3 + $0x8] sm:$0xff]  ;;  %v167_v2 = vld [vmem:[%s570_s3 + $0x30] sm:$0xff] }
  0x13   :  { %v161_v61 = vld [vmem:[%s570_s3] sm:$0xff]  ;;  %v166_v0 = vld [vmem:[%s570_s3 + $0x28] sm:$0xff]  ;;  %v164_v3 = vld [vmem:[%s570_s3 + $0x18] sm:$0xff] }
  0x14   :  { %v165_v62 = vld [vmem:[%s570_s3 + $0x20] sm:$0xff]  ;;  %v168_v4 = vld [vmem:[%s570_s3 + $0x38] sm:$0xff] }
  0x16   :  { %54 = vperm.xlu0 %368, %v40_v14   ;;  %49 = vperm.xlu1 %369, %v39_v15  }
  0x18   :  { %341 = vmatmul.msk.f32.gmra.mxu0 %vm87_vm0, %v31_v16  ;;  %346 = vmatmul.msk.f32.gmra.mxu2 %vm87_vm0, %v36_v17 }
  0x1a   :  { %214 = vperm.xlu2 %370, %v176_v18  }
  0x1e   :  { %209 = vperm.xlu0 %368, %v175_v19   ;;  %204 = vperm.xlu1 %369, %v174_v20  }
  0x20   :  { %342 = vmatmul.msk.f32.gmra.mxu0 %vm87_vm0, %v32_v21 }
  0x22   :  { %199 = vperm.xlu2 %370, %v173_v22  }
  0x26   :  { %194 = vperm.xlu0 %368, %v172_v23   ;;  %189 = vperm.xlu1 %369, %v171_v24  }
  0x28   :  { %343 = vmatmul.msk.f32.gmra.mxu0 %vm87_vm0, %v33_v25 }
  0x2a   :  { %184 = vperm.xlu2 %370, %v170_v26  }
  0x2e   :  { %179 = vperm.xlu0 %368, %v169_v27   ;;  %295 = vperm.xlu1 %369, %v292_v28  }
  0x64   :  { %v65_v40 = vpop.permute.xlu2 %64 }
  0x6c   :  { %v60_v50 = vpop.permute.xlu2 %59 }
  0x74   :  { %v215_v9 = vpop.permute.xlu2 %214 }
  0x78   :  { %v85_v32 = vpop.permute.xlu0 %84  ;;  %v75_v34 = vpop.permute.xlu1 %74 }
  0x7c   :  { %v200_v14 = vpop.permute.xlu2 %199 }
  0x80   :  { %v80_v36 = vpop.permute.xlu0 %79  ;;  %v70_v44 = vpop.permute.xlu1 %69 }
  0x85   :  { %v129_v29 = vpop.f32.mrf.mxu0 }
  0x88   :  { %v55_v53 = vpop.permute.xlu0 %54  ;;  %v50_v54 = vpop.permute.xlu1 %49 }
  0x89   :  { %v130_v57 = vadd.f32 %v129_v29, %v50_v54  ;;  %v185_v29 = vpop.permute.xlu2 %184 }
  0x8b   :  { %v144_v30 = vpop.f32.mrf.mxu2  ;;  %v153_v60 = vmax.f32 %v130_v57, 0.0 }
  0x8c   :  { %v145_v42 = vadd.f32 %v144_v30, %v75_v34 }
  0x8d   :  { %v132_v31 = vpop.f32.mrf.mxu0 }
  0x8e   :  { %v158_v46 = vmax.f32 %v145_v42, 0.0  ;;  %v133_v55 = vadd.f32 %v132_v31, %v55_v53 }
  0x90   :  { %v154_v59 = vmax.f32 %v133_v55, 0.0  ;;  %v210_v10 = vpop.permute.xlu0 %209  ;;  %v205_v13 = vpop.permute.xlu1 %204 }
  0x93   :  { %v147_v33 = vpop.f32.mrf.mxu2 }
  0x94   :  { %v148_v38 = vadd.f32 %v147_v33, %v80_v36 }
  0x95   :  { %v135_v35 = vpop.f32.mrf.mxu0 }
  0x96   :  { %v159_v45 = vmax.f32 %v148_v38, 0.0  ;;  %v136_v51 = vadd.f32 %v135_v35, %v60_v50 }
  0x98   :  { %v155_v58 = vmax.f32 %v136_v51, 0.0  ;;  %v195_v18 = vpop.permute.xlu0 %194  ;;  %v190_v26 = vpop.permute.xlu1 %189 }
  0x9b   :  { %v150_v37 = vpop.f32.mrf.mxu2 }
  0x9c   :  { %v151_v39 = vadd.f32 %v150_v37, %v85_v32  ;;  %v291_v37 = vld [vmem:[%s572_s5] sm:$0x1] }
  0x9d   :  { %v138_v41 = vpop.f32.mrf.mxu0 }
  0x9e   :  { %v160_v43 = vmax.f32 %v151_v39, 0.0  ;;  %v139_v48 = vadd.f32 %v138_v41, %v65_v40 }
  0xa0   :  { %250 = vmatpush.msra.mxu1 %v160_v43  ;;  %358 = vmatpush.msra.mxu3 %v160_v43  ;;  %v156_v56 = vmax.f32 %v139_v48, 0.0  ;;  %v180_v32 = vpop.permute.xlu0 %179  ;;  %v296_v38 = vpop.permute.xlu1 %295 }
  0xa1   :  { %v298_v39 = vperm.slane %v296_v38, 0 }
  0xa2   :  { %251 = vmatpush.msra.mxu1 %v159_v45  ;;  %359 = vmatpush.msra.mxu3 %v159_v45 }
  0xa4   :  { %252 = vmatpush.msra.mxu1 %v158_v46  ;;  %360 = vmatpush.msra.mxu3 %v158_v46 }
  0xa5   :  { %v141_v47 = vpop.f32.mrf.mxu0 }
  0xa6   :  { %v142_v49 = vadd.f32 %v141_v47, %v70_v44 }
  0xa8   :  { %v157_v52 = vmax.f32 %v142_v49, 0.0 }
  0xaa   :  { %253 = vmatpush.msra.mxu1 %v157_v52  ;;  %361 = vmatpush.msra.mxu3 %v157_v52 }
  0xac   :  { %254 = vmatpush.msra.mxu1 %v156_v56  ;;  %362 = vmatpush.msra.mxu3 %v156_v56 }
  0xae   :  { %255 = vmatpush.msra.mxu1 %v155_v58  ;;  %363 = vmatpush.msra.mxu3 %v155_v58 }
  0xb0   :  { %256 = vmatpush.msra.mxu1 %v154_v59  ;;  %364 = vmatpush.msra.mxu3 %v154_v59 }
  0xb2   :  { %257 = vmatpush.msra.mxu1 %v153_v60  ;;  %365 = vmatpush.msra.mxu3 %v153_v60 }
  0xb3   :  { %347 = vmatmul.msk.f32.vlgmr.msra.gmra.mxu1 %vm217_vm1, %v161_v61  ;;  %351 = vmatmul.msk.f32.vlgmr.msra.gmra.mxu3 %vm217_vm1, %v165_v62 }
  0xbb   :  { %348 = vmatmul.msk.f32.gmra.mxu1 %vm217_vm1, %v162_v63  ;;  %352 = vmatmul.msk.f32.gmra.mxu3 %vm217_vm1, %v166_v0 }
  0xc3   :  { %349 = vmatmul.msk.f32.gmra.mxu1 %vm217_vm1, %v163_v1  ;;  %353 = vmatmul.msk.f32.gmra.mxu3 %vm217_vm1, %v167_v2 }
  0xcb   :  { %350 = vmatmul.msk.f32.gmra.mxu1 %vm217_vm1, %v164_v3  ;;  %354 = vmatmul.msk.f32.gmra.mxu3 %vm217_vm1, %v168_v4 }
 0x130   :  { %v259_v5 = vpop.f32.mrf.mxu1 }
 0x131   :  { %v260_v33 = vadd.f32 %v259_v5, %v180_v32 }
 0x133   :  { %v283_v36 = vmax.f32 %v260_v33, 0.0 }
 0x136   :  { %v271_v6 = vpop.f32.mrf.mxu3 }
 0x137   :  { %v272_v22 = vadd.f32 %v271_v6, %v200_v14 }
 0x138   :  { %v262_v7 = vpop.f32.mrf.mxu1 }
 0x139   :  { %v287_v27 = vmax.f32 %v272_v22, 0.0  ;;  %v263_v30 = vadd.f32 %v262_v7, %v185_v29 }
 0x13b   :  { %v284_v35 = vmax.f32 %v263_v30, 0.0 }
 0x13e   :  { %v274_v8 = vpop.f32.mrf.mxu3 }
 0x13f   :  { %v275_v19 = vadd.f32 %v274_v8, %v205_v13 }
 0x140   :  { %v265_v12 = vpop.f32.mrf.mxu1 }
 0x141   :  { %v288_v24 = vmax.f32 %v275_v19, 0.0  ;;  %v266_v28 = vadd.f32 %v265_v12, %v190_v26 }
 0x143   :  { %v285_v34 = vmax.f32 %v266_v28, 0.0 }
 0x146   :  { %v277_v11 = vpop.f32.mrf.mxu3 }
 0x147   :  { %v278_v16 = vadd.f32 %v277_v11, %v210_v10 }
 0x148   :  { %v268_v21 = vpop.f32.mrf.mxu1 }
 0x149   :  { %v289_v23 = vmax.f32 %v278_v16, 0.0  ;;  %v269_v25 = vadd.f32 %v268_v21, %v195_v18 }
 0x14b   :  { %v286_v31 = vmax.f32 %v269_v25, 0.0 }
 0x14e   :  { %v280_v15 = vpop.f32.mrf.mxu3 }
 0x14f   :  { %v281_v17 = vadd.f32 %v280_v15, %v215_v9 }
 0x151   :  { %v290_v20 = vmax.f32 %v281_v17, 0.0 }
 0x153   :  { %310 = vmatpush.msrb.mxu2 %v290_v20 }
 0x155   :  { %311 = vmatpush.msrb.mxu2 %v289_v23 }
 0x157   :  { %312 = vmatpush.msrb.mxu2 %v288_v24 }
 0x159   :  { %313 = vmatpush.msrb.mxu2 %v287_v27 }
 0x15b   :  { %314 = vmatpush.msrb.mxu2 %v286_v31 }
 0x15d   :  { %315 = vmatpush.msrb.mxu2 %v285_v34 }
 0x15f   :  { %316 = vmatpush.msrb.mxu2 %v284_v35 }
 0x161   :  { %317 = vmatpush.msrb.mxu2 %v283_v36 }
 0x162   :  { %355 = vmatmul.msk.f32.vlgmr.msrb.gmra.mxu2 %vm217_vm1, %v291_v37 }
 0x1e5   :  { %v319_v40 = vpop.f32.mrf.mxu2 }
 0x1e6   :  { %v320_v41 = vadd.f32 %v319_v40, %v298_v39 }
 0x1e8   :  { %322 = vst [vmem:[#allocation3] sm:$0x1] %v320_v41 }
 0x1e9   :  { %333 = dma.vmem_to_hbm [thread:$0]  %s329_s17, 16, %s331_s20, [#allocation4]  }
 0x1ea   :  { %395 = dma.done.wait [#allocation4], 16  }
 0x1eb   :  { %396 = vsyncadd [#allocation4], 4294967280 }
 0x1ec   :  { %338 = vsyncpa [#allocation4], 1 }

</bundles_post_ra>
